<compile_context>
chip_gen: v6e
topology: v6e:2x2x1
jax: 0.10.0
libtpu: 0.0.40
codegen_flags: <defaults>
</compile_context>

<pallas_src>
import math

import jax
import jax.numpy as jnp
from jax.experimental import pallas as pl
from jax.experimental.pallas import tpu as pltpu

BATCH = 8
DIMENSION_LIST = [32, 16, 8]   # Linear(32->16), BN(16), ReLU, Dropout, Linear(16->8)
BN_EPS = 1e-5
LANE = 128                     # TPU lane width: pad last dims to this


def _round_up(n, m):
    return ((n + m - 1) // m) * m


# ----------------------------------------------------------------------------
# Kernel: fused (linear1 + BN + bias1) -> relu -> (linear2 + bias2)
# Biases are folded into the matmuls via the augmented-ones column, so the
# body is two MXU passes and one VPU max, nothing else.
# ----------------------------------------------------------------------------
def mlp_kernel(x_ref, p_ref, o_ref):
    # p_ref[0]: A1 (128,128) = [[W1.T*bn_scale ; 0], [bn_shift ; 1], [0 ; 0]]
    # p_ref[1]: A2 (128,128) = [[W2.T ; 0], [b2 ; 0], [0 ; 0]]
    h = jnp.dot(x_ref[...], p_ref[0], preferred_element_type=jnp.float32)
    h = jnp.maximum(h, 0.0)            # ReLU (the propagated ones column stays 1)
    # Dropout(p=0.1) is the identity in eval mode.
    # TODO(synk): training-mode dropout (pltpu.prng_*) and batch-stat BN are
    # not implemented; this kernel is the inference forward pass.
    o_ref[...] = jnp.dot(h, p_ref[1], preferred_element_type=jnp.float32)


# ----------------------------------------------------------------------------
# Parameter construction (PyTorch conventions: Linear weight is (out, in))
# ----------------------------------------------------------------------------
def init_raw_params(key):
    d0, d1, d2 = DIMENSION_LIST
    ks = jax.random.split(key, 8)
    s1 = 1.0 / math.sqrt(d0)
    W1 = jax.random.uniform(ks[0], (d1, d0), jnp.float32, -s1, s1)
    b1 = jax.random.uniform(ks[1], (d1,), jnp.float32, -s1, s1)
    gamma = 1.0 + 0.1 * jax.random.normal(ks[2], (d1,), jnp.float32)
    beta = 0.1 * jax.random.normal(ks[3], (d1,), jnp.float32)
    running_mean = 0.1 * jax.random.normal(ks[4], (d1,), jnp.float32)
    running_var = jax.random.uniform(ks[5], (d1,), jnp.float32, 0.5, 1.5)
    s2 = 1.0 / math.sqrt(d1)
    W2 = jax.random.uniform(ks[6], (d2, d1), jnp.float32, -s2, s2)
    b2 = jax.random.uniform(ks[7], (d2,), jnp.float32, -s2, s2)
    return dict(W1=W1, b1=b1, gamma=gamma, beta=beta,
                running_mean=running_mean, running_var=running_var,
                W2=W2, b2=b2)


def prepare_params(raw):
    """One-time host-side prep: fold eval-mode BatchNorm and BOTH biases into
    the matmul weights and pack everything into a single lane-padded slab of
    shape (2, 128, 128) so the kernel needs exactly one parameter DMA."""
    d0, d1, d2 = DIMENSION_LIST
    scale = raw["gamma"] * jax.lax.rsqrt(raw["running_var"] + BN_EPS)     # (d1,)
    w1_fused = raw["W1"].T * scale[None, :]                               # (d0, d1)
    shift = (raw["b1"] - raw["running_mean"]) * scale + raw["beta"]       # (d1,)

    # A1: augmented first matrix.  With x_aug = [x, 1, 0...]:
    #   h_aug = x_aug @ A1  ->  columns 0..d1-1 = x@W1'+shift, column d1 = 1.
    A1 = jnp.zeros((LANE, LANE), jnp.float32)
    A1 = A1.at[:d0, :d1].set(w1_fused)
    A1 = A1.at[d0, :d1].set(shift)
    A1 = A1.at[d0, d1].set(1.0)            # propagates the ones column to h_aug

    # A2: augmented second matrix.  h_aug @ A2 = h@W2.T + b2 in columns 0..d2-1.
    A2 = jnp.zeros((LANE, LANE), jnp.float32)
    A2 = A2.at[:d1, :d2].set(raw["W2"].T)
    A2 = A2.at[d1, :d2].set(raw["b2"])

    return jnp.stack([A1, A2])             # (2, 128, 128) float32


# ----------------------------------------------------------------------------
# Wrapper: lane-pad + augment x, grid over batch tiles ("parallel" axis)
# ----------------------------------------------------------------------------
def mlp_forward(x, params, *, batch_tile=256):
    """x: (B, d0) float32 -> (B, d2) float32."""
    d0, d1, d2 = DIMENSION_LIST
    B = x.shape[0]
    x = x.astype(jnp.float32)

    # Batch tile: multiple of 8 sublanes; grid over tiles amortizes launch/DMA
    # cost for large B and exposes a parallel axis for v7x's second core.
    tb = min(_round_up(B, 8), batch_tile)
    b_pad = _round_up(B, tb)
    grid = (b_pad // tb,)

    # Lane-pad x to 128 and append the ones column used for the bias folds.
    x_pad = jnp.zeros((b_pad, LANE), jnp.float32)
    x_pad = x_pad.at[:B, :d0].set(x)
    x_pad = x_pad.at[:B, d0].set(1.0)

    out = pl.pallas_call(
        mlp_kernel,
        out_shape=jax.ShapeDtypeStruct((b_pad, LANE), jnp.float32),
        grid=grid,
        in_specs=[
            pl.BlockSpec((tb, LANE), lambda i: (i, 0)),          # x tile
            pl.BlockSpec((2, LANE, LANE), lambda i: (0, 0, 0)),  # param slab (resident)
        ],
        out_specs=pl.BlockSpec((tb, LANE), lambda i: (i, 0)),
        compiler_params=pltpu.CompilerParams(
            dimension_semantics=("parallel",)),
        cost_estimate=pl.CostEstimate(
            flops=2 * b_pad * LANE * LANE * 2,
            bytes_accessed=4 * (b_pad * LANE + 2 * LANE * LANE + b_pad * LANE),
            transcendentals=0),
    )(x_pad, params)

    return out[:B, :d2]


# ----------------------------------------------------------------------------
# Pure-JAX reference (mirrors torch eval-mode forward, no algebraic folds)
# ----------------------------------------------------------------------------
def reference_forward(x, raw):
    h = x @ raw["W1"].T + raw["b1"]
    h = ((h - raw["running_mean"])
         / jnp.sqrt(raw["running_var"] + BN_EPS)) * raw["gamma"] + raw["beta"]
    h = jnp.maximum(h, 0.0)
    # dropout: identity in eval mode
    return h @ raw["W2"].T + raw["b2"]


if __name__ == "__main__":
    key = jax.random.PRNGKey(0)
    kx, kp = jax.random.split(key)
    x = jax.random.normal(kx, (BATCH, DIMENSION_LIST[0]), jnp.float32)

    raw = init_raw_params(kp)
    params = prepare_params(raw)          # one-time, outside the forward call

    out = jax.block_until_ready(mlp_forward(x, params))
    ref = reference_forward(x, raw)

    assert out.shape == (BATCH, DIMENSION_LIST[-1]), out.shape
    assert jnp.allclose(out, ref, rtol=1e-4, atol=1e-5), (out, ref)
    print("KERNEL_OK")
</pallas_src>

<mosaic_0001>
module attributes {stable_mosaic.version = 11 : i64} {
  func.func @mlp_kernel(%arg0: i32, %arg1: memref<8x128xf32, #tpu.memory_space<vmem>>, %arg2: memref<2x128x128xf32, #tpu.memory_space<vmem>>, %arg3: memref<8x128xf32, #tpu.memory_space<vmem>>) attributes {dimension_semantics = [#tpu.dimension_semantics<parallel>], iteration_bounds = array<i64: 1>, scalar_prefetch = 0 : i64, scratch_operands = 0 : i64, tpu.core_type = #tpu.core_type<tc>, window_params = [{transform_indices = @transform_0, window_bounds = array<i64: 8, 128>}, {pipeline_mode = #tpu.pipeline_mode<synchronous>, transform_indices = @transform_1, window_bounds = array<i64: 2, 128, 128>}, {transform_indices = @transform_2, window_bounds = array<i64: 8, 128>}]} {
    %c0 = arith.constant 0 : index
    %c0_0 = arith.constant 0 : index
    %0 = vector.load %arg1[%c0, %c0_0] : memref<8x128xf32, #tpu.memory_space<vmem>>, vector<8x128xf32>
    %c0_1 = arith.constant 0 : index
    %c0_2 = arith.constant 0 : index
    %c0_3 = arith.constant 0 : index
    %1 = vector.load %arg2[%c0_1, %c0_2, %c0_3] : memref<2x128x128xf32, #tpu.memory_space<vmem>>, vector<1x128x128xf32>
    %2 = vector.shape_cast %1 : vector<1x128x128xf32> to vector<128x128xf32>
    %cst = arith.constant dense<0.000000e+00> : vector<8x128xf32>
    %3 = tpu.matmul %0, %2, %cst {dimension_numbers = #tpu.dot_dimension_numbers<[1], [0], [0], [1], [0, 0, 1, 1], [], []>} : vector<8x128xf32>, vector<128x128xf32>, vector<8x128xf32> -> vector<8x128xf32>
    %cst_4 = arith.constant 0.000000e+00 : f32
    %4 = vector.broadcast %cst_4 : f32 to vector<8x128xf32>
    %5 = arith.maximumf %3, %4 : vector<8x128xf32>
    %c1 = arith.constant 1 : index
    %c0_5 = arith.constant 0 : index
    %c0_6 = arith.constant 0 : index
    %6 = vector.load %arg2[%c1, %c0_5, %c0_6] : memref<2x128x128xf32, #tpu.memory_space<vmem>>, vector<1x128x128xf32>
    %7 = vector.shape_cast %6 : vector<1x128x128xf32> to vector<128x128xf32>
    %cst_7 = arith.constant dense<0.000000e+00> : vector<8x128xf32>
    %8 = tpu.matmul %5, %7, %cst_7 {dimension_numbers = #tpu.dot_dimension_numbers<[1], [0], [0], [1], [0, 0, 1, 1], [], []>} : vector<8x128xf32>, vector<128x128xf32>, vector<8x128xf32> -> vector<8x128xf32>
    %c0_8 = arith.constant 0 : index
    %c0_9 = arith.constant 0 : index
    %9 = vector.load %arg3[%c0_8, %c0_9] : memref<8x128xf32, #tpu.memory_space<vmem>>, vector<8x128xf32>
    tpu.vector_store %arg3[%c0_8, %c0_9], %8 {strides = array<i32>} : memref<8x128xf32, #tpu.memory_space<vmem>>, vector<8x128xf32>,
    return
  }
  func.func @transform_0(%arg0: i32) -> (i32, i32) {
    %c0_i32 = arith.constant 0 : i32
    %c0_i32_0 = arith.constant 0 : i32
    return %arg0, %c0_i32 : i32, i32
  }
  func.func @transform_1(%arg0: i32) -> (i32, i32, i32) {
    %c0_i32 = arith.constant 0 : i32
    %c0_i32_0 = arith.constant 0 : i32
    %c0_i32_1 = arith.constant 0 : i32
    %c0_i32_2 = arith.constant 0 : i32
    return %c0_i32, %c0_i32_0, %c0_i32_1 : i32, i32, i32
  }
  func.func @transform_2(%arg0: i32) -> (i32, i32) {
    %c0_i32 = arith.constant 0 : i32
    %c0_i32_0 = arith.constant 0 : i32
    return %arg0, %c0_i32 : i32, i32
  }
}

</mosaic_0001>

<bundles_post_ra>
// kernel: tpu_custom_call.1
= control target key start
LH: loop header
LB: loop body
LE: loop exit
PB: predicated region body
PF: predicated region fallthrough
CT: control target
= control target key end

     0   :  { %7 = vsyncpa [#allocation3], 0  ;;  %s472_s0 = inlined_call_operand.hbm [shape: f32[8,128], index: 0, kind: input, shape index: {}]   ;;  %s473_s1 = inlined_call_operand.hbm [shape: f32[2,128,128], index: 1, kind: input, shape index: {}]   ;;  %s474_s2 = inlined_call_operand.hbm [shape: f32[8,128], index: 2, kind: output, shape index: {}]  }
   0x1   :  { %8 = vsyncpa [#allocation6], 0 }
   0x2   :  { %9 = vsyncpa [#allocation4], 0  ;;  %s407_s9 = smov [#allocation2]   ;;  %s408_s11 = smov [#allocation5]  }
   0x3   :  { %s16_s10 = sshll.u32 %s407_s9, 4  ;;  %s25_s12 = sshll.u32 %s408_s11, 4  ;;  %s17_s10 = int_to_ptr.vmem [resolvable:$true] %s16_s10  ;;  %s26_s12 = int_to_ptr.vmem [resolvable:$true] %s25_s12 }
   0x4   :  { %s349_s13 = scalar_lea.vmem %s17_s10, 128  ;;  %p354_p1 = scmp.lt.s32.totalorder %s17_s10, %s17_s10 }
   0x5   :  { %p350_p0 = scmp.ne.s32.totalorder %s17_s10, %s349_s13  ;;  %p355_p2 = scmp.lt.s32.totalorder %s349_s13, %s349_s13 }
   0x7   :  { %p356_p3 = por %p355_p2, %p354_p1 }
   0x9   :  { %p357_p4 = pnand %p356_p3, %p350_p0 }
   0xb   :  { %360 = shalt.err (!%p357_p4)
}
   0xc   :  { %19 = dma.hbm_to_vmem [thread:$0]  %s472_s0, 128, %s17_s10, [#allocation3]  }
   0xd   :  { %s369_s16 = scalar_lea.vmem %s26_s12, 4096  ;;  %p374_p6 = scmp.lt.s32.totalorder %s26_s12, %s26_s12 }
   0xe   :  { %p370_p5 = scmp.ne.s32.totalorder %s26_s12, %s369_s16  ;;  %p375_p7 = scmp.lt.s32.totalorder %s369_s16, %s369_s16 }
  0x10   :  { %p376_p8 = por %p375_p7, %p374_p6 }
  0x12   :  { %p377_p9 = pnand %p376_p8, %p370_p5 }
  0x14   :  { %380 = shalt.err (!%p377_p9)
}
  0x15   :  { %s409_s17 = smov 128   ;;  %s410_s18 = smov 8  }
  0x16   :  { %31 = dma.hbm_to_vmem [thread:$0]  %s473_s1, 4096, %s26_s12, [#allocation6], %s409_s17, %s409_s17, %s410_s18  }
  0x17   :  { %401 = dma.done.wait [#allocation3], 128  }
  0x18   :  { %402 = vsyncadd [#allocation3], 4294967168 }
  0x19   :  { %403 = dma.done.wait [#allocation6], 4096  }
  0x1a   :  { %404 = vsyncadd [#allocation6], 4294963200  ;;  %v411_v0 = vmov 0.0   ;;  %vm412_vm0 = vmmov 0   ;;  %v54_v1 = vld [vmem:[#allocation5 + $0x78] sm:$0xff]  ;;  %v53_v2 = vld [vmem:[#allocation5 + $0x70] sm:$0xff] }
  0x1b   :  { %264 = vmatprep.subr.mxu0 %v411_v0  ;;  %296 = vmatprep.mubr.msk.f32.mxu0 %vm412_vm0, %v411_v0  ;;  %v52_v3 = vld [vmem:[#allocation5 + $0x68] sm:$0xff]  ;;  %v51_v4 = vld [vmem:[#allocation5 + $0x60] sm:$0xff]  ;;  %v142_v5 = vld [vmem:[#allocation5 + $0xf8] sm:$0xff]  ;;  %s413_s0 = smov [#allocation7]  }
  0x1c   :  { %299 = vmatprep.subr.mxu1 %v411_v0  ;;  %331 = vmatprep.mubr.msk.f32.mxu1 %vm412_vm0, %v411_v0  ;;  %v50_v6 = vld [vmem:[#allocation5 + $0x58] sm:$0xff]  ;;  %v141_v7 = vld [vmem:[#allocation5 + $0xf0] sm:$0xff]  ;;  %v140_v8 = vld [vmem:[#allocation5 + $0xe8] sm:$0xff]  ;;  %s220_s1 = sshll.u32 %s413_s0, 4  ;;  %s221_s1 = int_to_ptr.vmem [resolvable:$true] %s220_s1 }
  0x1d   :  { %265 = vmatpush3.msra.mxu0 %v54_v1  ;;  %300 = vmatpush3.msra.mxu1 %v142_v5  ;;  %v49_v9 = vld [vmem:[#allocation5 + $0x50] sm:$0xff]  ;;  %v139_v10 = vld [vmem:[#allocation5 + $0xe0] sm:$0xff]  ;;  %v48_v11 = vld [vmem:[#allocation5 + $0x48] sm:$0xff]  ;;  %s381_s21 = scalar_lea.vmem %s221_s1, 128  ;;  %p386_p11 = scmp.lt.s32.totalorder %s221_s1, %s221_s1 }
  0x1e   :  { %266 = vmatprep.subr.mxu0 %v411_v0  ;;  %301 = vmatprep.subr.mxu1 %v411_v0  ;;  %v138_v12 = vld [vmem:[#allocation5 + $0xd8] sm:$0xff]  ;;  %v47_v13 = vld [vmem:[#allocation5 + $0x40] sm:$0xff]  ;;  %v137_v14 = vld [vmem:[#allocation5 + $0xd0] sm:$0xff]  ;;  %p382_p10 = scmp.ne.s32.totalorder %s221_s1, %s381_s21  ;;  %p387_p12 = scmp.lt.s32.totalorder %s381_s21, %s381_s21 }
  0x1f   :  { %267 = vmatpush3.msra.mxu0 %v53_v2  ;;  %302 = vmatpush3.msra.mxu1 %v141_v7  ;;  %v46_v15 = vld [vmem:[#allocation5 + $0x38] sm:$0xff]  ;;  %v136_v16 = vld [vmem:[#allocation5 + $0xc8] sm:$0xff]  ;;  %v45_v17 = vld [vmem:[#allocation5 + $0x30] sm:$0xff] }
  0x20   :  { %268 = vmatprep.subr.mxu0 %v411_v0  ;;  %303 = vmatprep.subr.mxu1 %v411_v0  ;;  %v135_v18 = vld [vmem:[#allocation5 + $0xc0] sm:$0xff]  ;;  %v44_v19 = vld [vmem:[#allocation5 + $0x28] sm:$0xff]  ;;  %v134_v20 = vld [vmem:[#allocation5 + $0xb8] sm:$0xff]  ;;  %p388_p13 = por %p387_p12, %p386_p11 }
  0x21   :  { %269 = vmatpush3.msra.mxu0 %v52_v3  ;;  %304 = vmatpush3.msra.mxu1 %v140_v8  ;;  %v43_v21 = vld [vmem:[#allocation5 + $0x20] sm:$0xff]  ;;  %v133_v22 = vld [vmem:[#allocation5 + $0xb0] sm:$0xff]  ;;  %v42_v23 = vld [vmem:[#allocation5 + $0x18] sm:$0xff] }
  0x22   :  { %270 = vmatprep.subr.mxu0 %v411_v0  ;;  %305 = vmatprep.subr.mxu1 %v411_v0  ;;  %v132_v24 = vld [vmem:[#allocation5 + $0xa8] sm:$0xff]  ;;  %v41_v25 = vld [vmem:[#allocation5 + $0x10] sm:$0xff]  ;;  %v131_v26 = vld [vmem:[#allocation5 + $0xa0] sm:$0xff]  ;;  %p389_p0 = pnand %p388_p13, %p382_p10 }
  0x23   :  { %271 = vmatpush3.msra.mxu0 %v51_v4  ;;  %306 = vmatpush3.msra.mxu1 %v139_v10  ;;  %v40_v27 = vld [vmem:[#allocation5 + $0x8] sm:$0xff]  ;;  %v130_v28 = vld [vmem:[#allocation5 + $0x98] sm:$0xff]  ;;  %v39_v29 = vld [vmem:[#allocation5] sm:$0xff] }
  0x24   :  { %272 = vmatprep.subr.mxu0 %v411_v0  ;;  %307 = vmatprep.subr.mxu1 %v411_v0  ;;  %v38_v30 = vld [vmem:[#allocation2] sm:$0xff]  ;;  %v129_v31 = vld [vmem:[#allocation5 + $0x90] sm:$0xff]  ;;  %v128_v32 = vld [vmem:[#allocation5 + $0x88] sm:$0xff] }
  0x25   :  { %273 = vmatpush3.msra.mxu0 %v50_v6  ;;  %308 = vmatpush3.msra.mxu1 %v138_v12  ;;  %v127_v33 = vld [vmem:[#allocation5 + $0x80] sm:$0xff] }
  0x26   :  { %274 = vmatprep.subr.mxu0 %v411_v0  ;;  %309 = vmatprep.subr.mxu1 %v411_v0 }
  0x27   :  { %275 = vmatpush3.msra.mxu0 %v49_v9  ;;  %310 = vmatpush3.msra.mxu1 %v137_v14 }
  0x28   :  { %276 = vmatprep.subr.mxu0 %v411_v0  ;;  %311 = vmatprep.subr.mxu1 %v411_v0 }
  0x29   :  { %277 = vmatpush3.msra.mxu0 %v48_v11  ;;  %312 = vmatpush3.msra.mxu1 %v136_v16 }
  0x2a   :  { %278 = vmatprep.subr.mxu0 %v411_v0  ;;  %313 = vmatprep.subr.mxu1 %v411_v0 }
  0x2b   :  { %279 = vmatpush3.msra.mxu0 %v47_v13  ;;  %314 = vmatpush3.msra.mxu1 %v135_v18 }
  0x2c   :  { %280 = vmatprep.subr.mxu0 %v411_v0  ;;  %315 = vmatprep.subr.mxu1 %v411_v0 }
  0x2d   :  { %281 = vmatpush3.msra.mxu0 %v46_v15  ;;  %316 = vmatpush3.msra.mxu1 %v134_v20 }
  0x2e   :  { %282 = vmatprep.subr.mxu0 %v411_v0  ;;  %317 = vmatprep.subr.mxu1 %v411_v0 }
  0x2f   :  { %283 = vmatpush3.msra.mxu0 %v45_v17  ;;  %318 = vmatpush3.msra.mxu1 %v133_v22 }
  0x30   :  { %284 = vmatprep.subr.mxu0 %v411_v0  ;;  %319 = vmatprep.subr.mxu1 %v411_v0 }
  0x31   :  { %285 = vmatpush3.msra.mxu0 %v44_v19  ;;  %320 = vmatpush3.msra.mxu1 %v132_v24 }
  0x32   :  { %286 = vmatprep.subr.mxu0 %v411_v0  ;;  %321 = vmatprep.subr.mxu1 %v411_v0 }
  0x33   :  { %287 = vmatpush3.msra.mxu0 %v43_v21  ;;  %322 = vmatpush3.msra.mxu1 %v131_v26 }
  0x34   :  { %288 = vmatprep.subr.mxu0 %v411_v0  ;;  %323 = vmatprep.subr.mxu1 %v411_v0 }
  0x35   :  { %289 = vmatpush3.msra.mxu0 %v42_v23  ;;  %324 = vmatpush3.msra.mxu1 %v130_v28 }
  0x36   :  { %290 = vmatprep.subr.mxu0 %v411_v0  ;;  %325 = vmatprep.subr.mxu1 %v411_v0 }
  0x37   :  { %291 = vmatpush3.msra.mxu0 %v41_v25  ;;  %326 = vmatpush3.msra.mxu1 %v129_v31 }
  0x38   :  { %292 = vmatprep.subr.mxu0 %v411_v0  ;;  %327 = vmatprep.subr.mxu1 %v411_v0 }
  0x39   :  { %293 = vmatpush3.msra.mxu0 %v40_v27  ;;  %328 = vmatpush3.msra.mxu1 %v128_v32 }
  0x3a   :  { %294 = vmatprep.subr.mxu0 %v411_v0  ;;  %329 = vmatprep.subr.mxu1 %v411_v0 }
  0x3b   :  { %295 = vmatpush3.msra.mxu0 %v39_v29  ;;  %330 = vmatpush3.msra.mxu1 %v127_v33 }
  0x3c   :  { %297 = vmatmul.mubr.f32.vlgmr.msra.gmra.mxu0 %v38_v30 }
  0xfc   :  { %v121_v34 = vpop.f32.mrf.mxu0 }
  0xfd   :  { %v125_v35 = vmax.f32 %v121_v34, 0.0 }
  0xfe   :  { %v298_v36 = vpop.f32.mrf.mxu0 }
  0xff   :  { %332 = vmatmul.mubr.f32.vlgmr.msra.gmra.mxu1 %v125_v35 }
 0x1bf   :  { %v209_v37 = vpop.f32.mrf.mxu1 }
 0x1c0   :  { %213 = vst [vmem:[#allocation7] sm:$0xff] %v209_v37 }
 0x1c1   :  { %v333_v38 = vpop.f32.mrf.mxu1 }
 0x1c2   :  { %392 = shalt.err (!%p389_p0)
}
 0x1c3   :  { %223 = dma.vmem_to_hbm [thread:$0]  %s221_s1, 128, %s474_s2, [#allocation4]  }
 0x1c4   :  { %405 = dma.done.wait [#allocation4], 128  }
 0x1c5   :  { %406 = vsyncadd [#allocation4], 4294967168 }
 0x1c6   :  { %227 = vsyncpa [#allocation3], 1 }
 0x1c7   :  { %228 = vsyncpa [#allocation6], 1 }
 0x1c8   :  { %229 = vsyncpa [#allocation4], 1 }

</bundles_post_ra>
